<compile_context>
chip_gen: v7x
topology: tpu7x:2x2x1
jax: 0.10.0
libtpu: 0.0.40
codegen_flags: <defaults>
</compile_context>

<pallas_src>
import functools

import jax
import jax.numpy as jnp
from jax.experimental import pallas as pl
from jax.experimental.pallas import tpu as pltpu


LANE = 128


def _round_up(x, m):
    return ((x + m - 1) // m) * m


def prepare_weight(weight):
    """One-time weight preparation: (num_class, inc) -> (inc, nc_pad) lane-dense.

    Do this ONCE at parameter-init time and cache the result; doing it per call
    reintroduces a transpose+pad through HBM on every forward.
    """
    num_class, inc = weight.shape
    nc_pad = _round_up(num_class, LANE)
    w_t = jnp.asarray(weight, dtype=jnp.float32).T        # (inc, num_class)
    if nc_pad != num_class:
        w_t = jnp.pad(w_t, ((0, 0), (0, nc_pad - num_class)))
    return w_t                                             # (inc, nc_pad)


def _choose_tb(B, inc, nc_pad, vmem_budget_bytes=12 * 1024 * 1024, max_tb=512):
    """Pick batch tile so double-buffered tiles + resident weight fit the budget."""
    fixed = 2 * inc * nc_pad * 4                       # weight (double-buffered by Pallas)
    per_row = 2 * inc * 4 + 2 * inc * 4 + 2 * nc_pad * 4  # x + xnorm + out, 2 bufs each
    avail = max(vmem_budget_bytes - fixed, per_row * 8)
    tb = min(max_tb, avail // per_row)
    tb = max(8, (tb // 8) * 8)
    tb = min(tb, _round_up(B, 8))
    return int(tb)


def _predictor_kernel(x_ref, wt_ref, out_ref, xnorm_ref, *, inv_temp, mxu_bf16):
    x = x_ref[...].astype(jnp.float32)                         # (TB, inc)

    # F.normalize: x / max(||x||_2, 1e-12)  ==  x * rsqrt(max(||x||^2, 1e-24))
    sq_sum = jnp.sum(x * x, axis=-1, keepdims=True)            # (TB, 1)
    inv_norm = jax.lax.rsqrt(jnp.maximum(sq_sum, 1e-24))       # EUP rsqrt
    x_norm = x * inv_norm                                      # (TB, inc)

    xnorm_ref[...] = x_norm.astype(xnorm_ref.dtype)

    if mxu_bf16:
        lhs = x_norm.astype(jnp.bfloat16)
        rhs = wt_ref[...].astype(jnp.bfloat16)
    else:
        lhs = x_norm
        rhs = wt_ref[...].astype(jnp.float32)

    logits = jnp.dot(lhs, rhs, preferred_element_type=jnp.float32) * inv_temp
    out_ref[...] = logits.astype(out_ref.dtype)                # (TB, nc_pad)


def predictor_forward(x, weight, *, temp=0.05, reverse=False, eta=0.1,
                      prepared=False, num_class=None, mxu_bf16=None):
    """Forward pass of Predictor.

    x       : (B, inc) float32
    weight  : either the raw nn.Linear weight (num_class, inc), or — preferred —
              the cached output of prepare_weight() with prepared=True and
              num_class given.

    Returns (x_out, x_out, x_norm), matching the PyTorch module.
    `reverse`/`eta` only affect the backward pass (gradient reversal); the
    forward computation is identical, so they are accepted and ignored here.
    """
    del reverse, eta  # identity in forward

    B, inc = x.shape
    if prepared:
        assert num_class is not None, "pass num_class with a prepared weight"
        w_t = weight
    else:
        num_class = weight.shape[0]
        w_t = prepare_weight(weight)   # NOTE: cache prepare_weight() in real use
    inc_w, nc_pad = w_t.shape
    assert inc_w == inc

    if mxu_bf16 is None:
        # Only worth it for large matmuls; keeps f32 accuracy at small shapes.
        mxu_bf16 = (inc * nc_pad) >= (1 << 21)

    TB = _choose_tb(B, inc, nc_pad)
    B_pad = _round_up(B, TB)
    x_in = x if B_pad == B else jnp.pad(x, ((0, B_pad - B), (0, 0)))

    kernel = functools.partial(
        _predictor_kernel, inv_temp=float(1.0 / temp), mxu_bf16=bool(mxu_bf16))

    out_pad, xnorm_pad = pl.pallas_call(
        kernel,
        out_shape=(
            jax.ShapeDtypeStruct((B_pad, nc_pad), x.dtype),
            jax.ShapeDtypeStruct((B_pad, inc), x.dtype),
        ),
        grid=(B_pad // TB,),
        in_specs=[
            pl.BlockSpec((TB, inc), lambda i: (i, 0)),          # stream x rows
            pl.BlockSpec((inc, nc_pad), lambda i: (0, 0)),      # weight resident
        ],
        out_specs=(
            pl.BlockSpec((TB, nc_pad), lambda i: (i, 0)),       # lane-dense logits
            pl.BlockSpec((TB, inc), lambda i: (i, 0)),
        ),
        compiler_params=pltpu.CompilerParams(
            dimension_semantics=("parallel",),
        ),
    )(x_in, w_t)

    x_out = out_pad[:B, :num_class]
    x_norm = xnorm_pad[:B, :]
    return x_out, x_out, x_norm


def _reference(x, weight, temp=0.05):
    norm = jnp.sqrt(jnp.sum(x * x, axis=-1, keepdims=True))
    x_norm = x / jnp.maximum(norm, 1e-12)
    x_out = x_norm @ weight.T / temp
    return x_out, x_out, x_norm


if __name__ == "__main__":
    # Small shapes consistent with Predictor(num_class, inc): x is (B, inc).
    B, inc, num_class = 8, 256, 64
    temp = 0.05

    key = jax.random.PRNGKey(0)
    kx, kw = jax.random.split(key)
    x = jax.random.normal(kx, (B, inc), dtype=jnp.float32)
    # Deterministic synthetic weight for fc = nn.Linear(inc, num_class, bias=False)
    weight = jax.random.normal(kw, (num_class, inc), dtype=jnp.float32) * 0.02

    # Prepare (transpose + lane-pad) the weight ONCE, as a caller would cache it.
    w_prepared = prepare_weight(weight)
    jax.block_until_ready(w_prepared)

    x_out, x_out2, x_norm = predictor_forward(
        x, w_prepared, temp=temp, prepared=True, num_class=num_class)
    jax.block_until_ready((x_out, x_out2, x_norm))

    # Sanity check against a pure-JAX reference.
    r_out, _, r_norm = _reference(x, weight, temp)
    assert x_out.shape == (B, num_class) and x_norm.shape == (B, inc)
    assert jnp.allclose(x_out, r_out, atol=1e-4, rtol=1e-4), "x_out mismatch"
    assert jnp.allclose(x_norm, r_norm, atol=1e-5, rtol=1e-5), "x_norm mismatch"

    # Also exercise the convenience (unprepared-weight) path once.
    y_out, _, y_norm = predictor_forward(x, weight, temp=temp)
    jax.block_until_ready((y_out, y_norm))
    assert jnp.allclose(y_out, r_out, atol=1e-4, rtol=1e-4), "x_out mismatch (raw weight path)"

    print("KERNEL_OK")
</pallas_src>

<mosaic_0001>
module attributes {stable_mosaic.version = 11 : i64} {
  func.func @_predictor_kernel(%arg0: i32, %arg1: memref<8x256xf32, #tpu.memory_space<vmem>>, %arg2: memref<256x128xf32, #tpu.memory_space<vmem>>, %arg3: memref<8x128xf32, #tpu.memory_space<vmem>>, %arg4: memref<8x256xf32, #tpu.memory_space<vmem>>) attributes {dimension_semantics = [#tpu.dimension_semantics<parallel>], iteration_bounds = array<i64: 1>, scalar_prefetch = 0 : i64, scratch_operands = 0 : i64, tpu.core_type = #tpu.core_type<tc>, window_params = [{transform_indices = @transform_0, window_bounds = array<i64: 8, 256>}, {pipeline_mode = #tpu.pipeline_mode<synchronous>, transform_indices = @transform_1, window_bounds = array<i64: 256, 128>}, {transform_indices = @transform_2, window_bounds = array<i64: 8, 128>}, {transform_indices = @transform_3, window_bounds = array<i64: 8, 256>}]} {
    %c0 = arith.constant 0 : index
    %c0_0 = arith.constant 0 : index
    %0 = vector.load %arg1[%c0, %c0_0] : memref<8x256xf32, #tpu.memory_space<vmem>>, vector<8x256xf32>
    %1 = arith.mulf %0, %0 : vector<8x256xf32>
    %cst = arith.constant dense<0.000000e+00> : vector<8xf32>
    %2 = vector.multi_reduction <add>, %1, %cst [1] : vector<8x256xf32> to vector<8xf32>
    %3 = vector.shape_cast %2 : vector<8xf32> to vector<8x1xf32>
    %cst_1 = arith.constant 1.000000e-24 : f32
    %4 = vector.broadcast %cst_1 : f32 to vector<8x1xf32>
    %5 = arith.maximumf %3, %4 : vector<8x1xf32>
    %6 = math.rsqrt %5 : vector<8x1xf32>
    %7 = vector.broadcast %6 : vector<8x1xf32> to vector<8x256xf32>
    %8 = arith.mulf %0, %7 : vector<8x256xf32>
    %c0_2 = arith.constant 0 : index
    %c0_3 = arith.constant 0 : index
    %9 = vector.load %arg4[%c0_2, %c0_3] : memref<8x256xf32, #tpu.memory_space<vmem>>, vector<8x256xf32>
    tpu.vector_store %arg4[%c0_2, %c0_3], %8 {strides = array<i32>} : memref<8x256xf32, #tpu.memory_space<vmem>>, vector<8x256xf32>,
    %c0_4 = arith.constant 0 : index
    %c0_5 = arith.constant 0 : index
    %10 = vector.load %arg2[%c0_4, %c0_5] : memref<256x128xf32, #tpu.memory_space<vmem>>, vector<256x128xf32>
    %cst_6 = arith.constant dense<0.000000e+00> : vector<8x128xf32>
    %11 = tpu.matmul %8, %10, %cst_6 {dimension_numbers = #tpu.dot_dimension_numbers<[1], [0], [0], [1], [0, 0, 1, 1], [], []>} : vector<8x256xf32>, vector<256x128xf32>, vector<8x128xf32> -> vector<8x128xf32>
    %cst_7 = arith.constant 2.000000e+01 : f32
    %12 = vector.broadcast %cst_7 : f32 to vector<8x128xf32>
    %13 = arith.mulf %11, %12 : vector<8x128xf32>
    %c0_8 = arith.constant 0 : index
    %c0_9 = arith.constant 0 : index
    %14 = vector.load %arg3[%c0_8, %c0_9] : memref<8x128xf32, #tpu.memory_space<vmem>>, vector<8x128xf32>
    tpu.vector_store %arg3[%c0_8, %c0_9], %13 {strides = array<i32>} : memref<8x128xf32, #tpu.memory_space<vmem>>, vector<8x128xf32>,
    return
  }
  func.func @transform_0(%arg0: i32) -> (i32, i32) {
    %c0_i32 = arith.constant 0 : i32
    %c0_i32_0 = arith.constant 0 : i32
    return %arg0, %c0_i32 : i32, i32
  }
  func.func @transform_1(%arg0: i32) -> (i32, i32) {
    %c0_i32 = arith.constant 0 : i32
    %c0_i32_0 = arith.constant 0 : i32
    %c0_i32_1 = arith.constant 0 : i32
    return %c0_i32, %c0_i32_0 : i32, i32
  }
  func.func @transform_2(%arg0: i32) -> (i32, i32) {
    %c0_i32 = arith.constant 0 : i32
    %c0_i32_0 = arith.constant 0 : i32
    return %arg0, %c0_i32 : i32, i32
  }
  func.func @transform_3(%arg0: i32) -> (i32, i32) {
    %c0_i32 = arith.constant 0 : i32
    %c0_i32_0 = arith.constant 0 : i32
    return %arg0, %c0_i32 : i32, i32
  }
}

</mosaic_0001>

<bundles_post_ra>
// kernel: tpu_custom_call.1
= control target key start
LH: loop header
LB: loop body
LE: loop exit
PB: predicated region body
PF: predicated region fallthrough
CT: control target
= control target key end

     0   :  { %9 = vsyncpa [#allocation3], 0  ;;  %s450_s0 = inlined_call_operand.hbm [shape: f32[8,256], index: 0, kind: input, shape index: {}]   ;;  %s451_s1 = inlined_call_operand.hbm [shape: f32[256,128], index: 1, kind: input, shape index: {}]   ;;  %s452_s2 = inlined_call_operand.hbm [shape: f32[8,128], index: 2, kind: output, shape index: {0}]   ;;  %s453_s3 = inlined_call_operand.hbm [shape: f32[8,256], index: 3, kind: output, shape index: {1}]  }
   0x1   :  { %10 = vsyncpa [#allocation6], 0 }
   0x2   :  { %11 = vsyncpa [#allocation4], 0 }
   0x3   :  { %12 = vsyncpa [#allocation9], 0  ;;  %s359_s12 = smov [#allocation2]   ;;  %s360_s14 = smov [#allocation5]  }
   0x4   :  { %s19_s13 = sshll.u32 %s359_s12, 4  ;;  %s28_s15 = sshll.u32 %s360_s14, 4  ;;  %s20_s13 = int_to_ptr.vmem [resolvable:$true] %s19_s13  ;;  %s385_s15 = int_to_ptr.vmem [resolvable:$true] %s28_s15 }
   0x5   :  { %s263_s18 = scalar_lea.hbm %s450_s0, 256 }
   0x6   :  { %p264_p0 = scmp.ne.s32.totalorder %s450_s0, %s263_s18  ;;  %p267_p1 = scmp.lt.u32.totalorder %s263_s18, %s450_s0 }
   0x8   :  { %p269_p2 = pnand %p267_p1, %p264_p0 }
   0xa   :  { %272 = shalt.err (!%p269_p2)
}
   0xb   :  { %s273_s23 = scalar_lea.vmem %s20_s13, 256  ;;  %p278_p4 = scmp.lt.s32.totalorder %s20_s13, %s20_s13 }
   0xc   :  { %p274_p3 = scmp.ne.s32.totalorder %s20_s13, %s273_s23  ;;  %p279_p5 = scmp.lt.s32.totalorder %s273_s23, %s273_s23 }
   0xe   :  { %p280_p6 = por %p279_p5, %p278_p4 }
  0x10   :  { %p281_p7 = pnand %p280_p6, %p274_p3 }
  0x12   :  { %284 = shalt.err (!%p281_p7)
}
  0x13   :  { %22 = dma.hbm_to_vmem [thread:$0]  %s450_s0, 256, %s20_s13, [#allocation3]  }
  0x14   :  { %s285_s28 = scalar_lea.hbm %s451_s1, 4096 }
  0x15   :  { %p286_p8 = scmp.ne.s32.totalorder %s451_s1, %s285_s28  ;;  %p289_p9 = scmp.lt.u32.totalorder %s285_s28, %s451_s1 }
  0x17   :  { %p291_p10 = pnand %p289_p9, %p286_p8 }
  0x19   :  { %294 = shalt.err (!%p291_p10)
}
  0x1a   :  { %s295_s6 = scalar_lea.vmem %s385_s15, 4096  ;;  %p300_p12 = scmp.lt.s32.totalorder %s385_s15, %s385_s15 }
  0x1b   :  { %p296_p11 = scmp.ne.s32.totalorder %s385_s15, %s295_s6  ;;  %p301_p13 = scmp.lt.s32.totalorder %s295_s6, %s295_s6 }
  0x1d   :  { %p302_p0 = por %p301_p13, %p300_p12 }
  0x1f   :  { %p303_p1 = pnand %p302_p0, %p296_p11 }
  0x21   :  { %306 = shalt.err (!%p303_p1)
}
  0x22   :  { %s361_s0 = smov 128   ;;  %s362_s7 = smov 8  }
  0x23   :  { %34 = dma.hbm_to_vmem [thread:$0]  %s451_s1, 4096, %s385_s15, [#allocation6], %s361_s0, %s361_s0, %s362_s7  }
  0x24   :  { %351 = dma.done.wait [#allocation3], 256  }
  0x25   :  { %352 = vsyncadd [#allocation3], 4294967040 }
  0x26   :  { %353 = dma.done.wait [#allocation6], 4096  }
  0x27   :  { %354 = vsyncadd [#allocation6], 4294963200  ;;  %v416_v0 = vld [vmem:[#allocation2] sm:$0xff]  ;;  %v418_v1 = vld [vmem:[#allocation2 + $0x8] sm:$0xff]  ;;  %s363_s1 = smov [#allocation8]  }
  0x28   :  { %v70_v2 = vld [vmem:[#allocation5 + $0x80] sm:$0xff]  ;;  %v43_v3 = vmul.f32 %v416_v0, %v416_v0  ;;  %v44_v4 = vmul.f32 %v418_v1, %v418_v1  ;;  %v71_v5 = vld [vmem:[#allocation5 + $0x88] sm:$0xff]  ;;  %v72_v10 = vld [vmem:[#allocation5 + $0x90] sm:$0xff]  ;;  %s174_s10 = sshll.u32 %s363_s1, 4  ;;  %s175_s10 = int_to_ptr.vmem [resolvable:$true] %s174_s10 }
  0x29   :  { %v54_v6 = vld [vmem:[#allocation5] sm:$0xff]  ;;  %v55_v7 = vld [vmem:[#allocation5 + $0x8] sm:$0xff]  ;;  %v223_v8 = vpack.c.bf16 %v71_v5, %v70_v2  ;;  %v73_v11 = vld [vmem:[#allocation5 + $0x98] sm:$0xff]  ;;  %s307_s11 = scalar_lea.vmem %s175_s10, 256  ;;  %p312_p3 = scmp.lt.s32.totalorder %s175_s10, %s175_s10 }
  0x2a   :  { %v225_v9 = vpack.c.bf16 %v55_v7, %v54_v6  ;;  %v56_v12 = vld [vmem:[#allocation5 + $0x10] sm:$0xff]  ;;  %v45_v13 = vadd.f32 %v44_v4, %v43_v3  ;;  %v227_v14 = vpack.c.bf16 %v73_v11, %v72_v10  ;;  %v57_v15 = vld [vmem:[#allocation5 + $0x18] sm:$0xff]  ;;  %v74_v16 = vld [vmem:[#allocation5 + $0xa0] sm:$0xff]  ;;  %p308_p2 = scmp.ne.s32.totalorder %s175_s10, %s307_s11  ;;  %p313_p4 = scmp.lt.s32.totalorder %s307_s11, %s307_s11 }
  0x2b   :  { %v75_v17 = vld [vmem:[#allocation5 + $0xa8] sm:$0xff]  ;;  %224 = vmatprep.subr.bf16.mxu0 %v223_v8  ;;  %v229_v18 = vpack.c.bf16 %v57_v15, %v56_v12  ;;  %v58_v20 = vld [vmem:[#allocation5 + $0x20] sm:$0xff]  ;;  %v76_v22 = vld [vmem:[#allocation5 + $0xb0] sm:$0xff] }
  0x2c   :  { %46 = vadd.xlane.f32.xlu0 %v45_v13  ;;  %226 = vmatpush3.bf16.msra.mxu0 %v225_v9  ;;  %v231_v19 = vpack.c.bf16 %v75_v17, %v74_v16  ;;  %v59_v21 = vld [vmem:[#allocation5 + $0x28] sm:$0xff]  ;;  %v77_v23 = vld [vmem:[#allocation5 + $0xb8] sm:$0xff]  ;;  %v60_v26 = vld [vmem:[#allocation5 + $0x30] sm:$0xff]  ;;  %p314_p5 = por %p313_p4, %p312_p3 }
  0x2d   :  { %228 = vmatprep.subr.bf16.mxu0 %v227_v14  ;;  %v233_v24 = vpack.c.bf16 %v59_v21, %v58_v20  ;;  %v235_v25 = vpack.c.bf16 %v77_v23, %v76_v22  ;;  %v61_v27 = vld [vmem:[#allocation5 + $0x38] sm:$0xff]  ;;  %v78_v29 = vld [vmem:[#allocation5 + $0xc0] sm:$0xff]  ;;  %v79_v30 = vld [vmem:[#allocation5 + $0xc8] sm:$0xff] }
  0x2e   :  { %v237_v28 = vpack.c.bf16 %v61_v27, %v60_v26  ;;  %v239_v31 = vpack.c.bf16 %v79_v30, %v78_v29  ;;  %v62_v32 = vld [vmem:[#allocation5 + $0x40] sm:$0xff]  ;;  %v63_v33 = vld [vmem:[#allocation5 + $0x48] sm:$0xff]  ;;  %v80_v35 = vld [vmem:[#allocation5 + $0xd0] sm:$0xff]  ;;  %p315_p6 = pnand %p314_p5, %p308_p2 }
  0x2f   :  { %v241_v34 = vpack.c.bf16 %v63_v33, %v62_v32  ;;  %v81_v36 = vld [vmem:[#allocation5 + $0xd8] sm:$0xff]  ;;  %v64_v38 = vld [vmem:[#allocation5 + $0x50] sm:$0xff]  ;;  %v82_v40 = vld [vmem:[#allocation5 + $0xe0] sm:$0xff] }
  0x30   :  { %230 = vmatpush3.bf16.msra.mxu0 %v229_v18  ;;  %v243_v37 = vpack.c.bf16 %v81_v36, %v80_v35  ;;  %v65_v39 = vld [vmem:[#allocation5 + $0x58] sm:$0xff]  ;;  %v83_v42 = vld [vmem:[#allocation5 + $0xe8] sm:$0xff]  ;;  %v66_v43 = vld [vmem:[#allocation5 + $0x60] sm:$0xff] }
  0x31   :  { %232 = vmatprep.subr.bf16.mxu0 %v231_v19  ;;  %v245_v41 = vpack.c.bf16 %v65_v39, %v64_v38  ;;  %v67_v44 = vld [vmem:[#allocation5 + $0x68] sm:$0xff]  ;;  %v247_v45 = vpack.c.bf16 %v83_v42, %v82_v40  ;;  %v84_v46 = vld [vmem:[#allocation5 + $0xf0] sm:$0xff]  ;;  %v85_v47 = vld [vmem:[#allocation5 + $0xf8] sm:$0xff] }
  0x32   :  { %v249_v48 = vpack.c.bf16 %v67_v44, %v66_v43  ;;  %v251_v49 = vpack.c.bf16 %v85_v47, %v84_v46  ;;  %v68_v50 = vld [vmem:[#allocation5 + $0x70] sm:$0xff]  ;;  %v69_v51 = vld [vmem:[#allocation5 + $0x78] sm:$0xff] }
  0x33   :  { %v253_v52 = vpack.c.bf16 %v69_v51, %v68_v50 }
  0x34   :  { %234 = vmatpush3.bf16.msra.mxu0 %v233_v24 }
  0x35   :  { %236 = vmatprep.subr.bf16.mxu0 %v235_v25 }
  0x38   :  { %238 = vmatpush3.bf16.msra.mxu0 %v237_v28 }
  0x39   :  { %240 = vmatprep.subr.bf16.mxu0 %v239_v31 }
  0x3c   :  { %242 = vmatpush3.bf16.msra.mxu0 %v241_v34 }
  0x3d   :  { %244 = vmatprep.subr.bf16.mxu0 %v243_v37 }
  0x40   :  { %246 = vmatpush3.bf16.msra.mxu0 %v245_v41 }
  0x41   :  { %248 = vmatprep.subr.bf16.mxu0 %v247_v45 }
  0x44   :  { %250 = vmatpush3.bf16.msra.mxu0 %v249_v48 }
  0x45   :  { %252 = vmatprep.subr.bf16.mxu0 %v251_v49 }
  0x48   :  { %254 = vmatpush3.bf16.msra.mxu0 %v253_v52 }
  0xb9   :  { %v47_v53 = vpop.xlane.xlu0 %46 }
  0xba   :  { %v48_v54 = vmax.f32 %v47_v53, 1e-24 }
  0xbc   :  { %261 = vrsqrt.f32 %v48_v54 }
  0xc6   :  { %v262_v55 = vpop.eup %261 }
  0xc7   :  { %v51_v56 = vmul.f32 %v262_v55, %v418_v1  ;;  %v50_v57 = vmul.f32 %v262_v55, %v416_v0 }
  0xc9   :  { %150 = vmatprep.mubr.f32.mxu0 %v51_v56  ;;  %53 = vst [vmem:[#allocation8 + $0x8] sm:$0xff] %v51_v56  ;;  %52 = vst [vmem:[#allocation8] sm:$0xff] %v50_v57 }
  0xca   :  { %151 = vmatmul.mubr.f32.vlgmr.msra.gmra.mrb[0].mxu0 %v50_v57 }
  0xcb   :  { %318 = shalt.err (!%p315_p6)
}
  0xcc   :  { %s319_s14 = scalar_lea.hbm %s453_s3, 256 }
  0xcd   :  { %p320_p7 = scmp.ne.s32.totalorder %s453_s3, %s319_s14  ;;  %p323_p8 = scmp.lt.u32.totalorder %s319_s14, %s453_s3 }
  0xcf   :  { %p325_p9 = pnand %p323_p8, %p320_p7 }
  0xd1   :  { %328 = shalt.err (!%p325_p9)
}
  0xd2   :  { %177 = dma.vmem_to_hbm [thread:$0]  %s175_s10, 256, %s453_s3, [#allocation9]  }
  0xd3   :  { %s364_s21 = smov [#allocation7]  }
  0xd4   :  { %s164_s22 = sshll.u32 %s364_s21, 4  ;;  %s165_s22 = int_to_ptr.vmem [resolvable:$true] %s164_s22 }
  0xd5   :  { %s329_s23 = scalar_lea.vmem %s165_s22, 128  ;;  %p334_p11 = scmp.lt.s32.totalorder %s165_s22, %s165_s22 }
  0xd6   :  { %p330_p10 = scmp.ne.s32.totalorder %s165_s22, %s329_s23  ;;  %p335_p12 = scmp.lt.s32.totalorder %s329_s23, %s329_s23 }
  0xd8   :  { %p336_p13 = por %p335_p12, %p334_p11 }
  0xda   :  { %p337_p0 = pnand %p336_p13, %p330_p10 }
 0x19d   :  { %v220_v58 = vpop.f32.mrb[0].mxu0 }
 0x19e   :  { %v221_v59 = vpop.f32.mrb[1].mxu0 }
 0x19f   :  { %v222_v60 = vadd.f32 %v221_v59, %v220_v58 }
 0x1a1   :  { %v156_v61 = vmul.f32 20.0, %v222_v60 }
 0x1a3   :  { %157 = vst [vmem:[#allocation7] sm:$0xff] %v156_v61 }
 0x1a4   :  { %340 = shalt.err (!%p337_p0)
}
 0x1a5   :  { %s341_s26 = scalar_lea.hbm %s452_s2, 128 }
 0x1a6   :  { %p342_p1 = scmp.ne.s32.totalorder %s452_s2, %s341_s26  ;;  %p345_p2 = scmp.lt.u32.totalorder %s341_s26, %s452_s2 }
 0x1a8   :  { %p347_p3 = pnand %p345_p2, %p342_p1 }
 0x1aa   :  { %350 = shalt.err (!%p347_p3)
}
 0x1ab   :  { %167 = dma.vmem_to_hbm [thread:$0]  %s165_s22, 128, %s452_s2, [#allocation4]  }
 0x1ac   :  { %355 = dma.done.wait [#allocation4], 128  }
 0x1ad   :  { %356 = vsyncadd [#allocation4], 4294967168 }
 0x1ae   :  { %357 = dma.done.wait [#allocation9], 256  }
 0x1af   :  { %358 = vsyncadd [#allocation9], 4294967040 }
 0x1b0   :  { %184 = vsyncpa [#allocation3], 1 }
 0x1b1   :  { %185 = vsyncpa [#allocation6], 1 }
 0x1b2   :  { %186 = vsyncpa [#allocation4], 1 }
 0x1b3   :  { %187 = vsyncpa [#allocation9], 1 }

</bundles_post_ra>
